<compile_context>
chip_gen: v5e
topology: v5e:2x2
jax: 0.10.0
libtpu: 0.0.40
codegen_flags: <defaults>
</compile_context>

<pallas_src>
import functools

import jax
import jax.numpy as jnp
from jax.experimental import pallas as pl
from jax.experimental.pallas import tpu as pltpu


def _ffn_kernel(x_ref, w1_ref, b1_ref, w2_ref, b2_ref, o_ref, *, bf16_epilogue):
    # x_ref : (Bt, S, H)   f32   (S = num_patches + 1, CLS row included)
    # w1_ref: (H, Hp)      bf16  (W1^T, out-dim zero-padded to Hp)
    # b1_ref: (1, Hp)      f32
    # w2_ref: (Hp, Pp)     bf16  (W2^T, zero-padded rows/cols)
    # b2_ref: (1, Pp)      f32
    # o_ref : (Bt, S, Pp)  f32   (CLS row + padded cols dropped in the wrapper)
    bt = x_ref.shape[0]
    w1 = w1_ref[...]
    w2 = w2_ref[...]
    b2 = b2_ref[...]
    if bf16_epilogue:
        b1 = b1_ref[...].astype(jnp.bfloat16)   # v6e/v7x: native bf16 VPU
    else:
        b1 = b1_ref[...]                        # v5e: keep f32 epilogue

    # Small static unrolled loop over the batch block; x_ref[i] is a clean
    # 2-D (S, H) leading-index view (no reshape/relayout).
    for i in range(bt):
        x = x_ref[i].astype(jnp.bfloat16)                               # (S, H)
        h = jnp.dot(x, w1, preferred_element_type=jnp.float32)          # (S, Hp)
        if bf16_epilogue:
            h = jnp.maximum(h.astype(jnp.bfloat16) + b1, 0.0)
        else:
            h = jnp.maximum(h + b1, 0.0).astype(jnp.bfloat16)
        out = jnp.dot(h, w2, preferred_element_type=jnp.float32) + b2   # (S, Pp)
        o_ref[i] = out.astype(o_ref.dtype)


def _round_up(x, m):
    return ((x + m - 1) // m) * m


def _vmem_cap_bytes():
    """~80% of this generation's physical VMEM per TensorCore."""
    try:
        cap = getattr(pltpu.get_tpu_info(), "vmem_capacity_bytes", None)
        if cap:
            return int(cap * 0.8)
    except Exception:
        pass
    return 48 * 2**20  # conservative fallback: fits v7x's 64 MiB per TC


def _bf16_epilogue_ok():
    """bf16 VALU exists on v6e/v7x; v5e (and older) emulate -> keep f32."""
    try:
        kind = jax.devices()[0].device_kind.lower()
        return ("v6" in kind) or ("v7" in kind)
    except Exception:
        return False


def _pick_batch_block(B, S, H, Hp, Pp, vmem_cap):
    """Largest divisor of B (<= 8) whose per-step footprint fits the budget,
    keeping grid length >= 2 so v7x's two TensorCores both get work."""
    w_bytes = (H * Hp + Hp * Pp) * 2 + (Hp + Pp) * 4
    budget = max(vmem_cap - 2 * w_bytes - (8 << 20), 4 << 20)

    def step_bytes(bt):
        act = 2 * bt * S * (H + Pp) * 4            # double-buffered x + out blocks
        tmp = bt * S * (2 * H + 4 * Hp + 4 * Pp)   # bf16 x, f32 h, f32 out temps
        return act + tmp

    max_bt = 8
    if B >= 2:
        max_bt = min(max_bt, B // 2)               # grid length >= 2
    bt = 1
    for cand in range(1, max(max_bt, 1) + 1):
        if B % cand == 0 and step_bytes(cand) <= budget:
            bt = cand
    return bt


def prepare_ffn_params(params, *, hidden_size, num_patches):
    """One-time weight glue, hoisted out of the per-call path: transpose to
    (in, out), zero-pad lane dims to multiples of 128, cast to bf16."""
    w1, b1, w2, b2 = params  # torch shapes: w1:(H,H) (out,in); w2:(P,H); b1:(H,); b2:(P,)
    H, P = hidden_size, num_patches
    Hp = _round_up(H, 128)
    Pp = _round_up(P, 128)
    w1_t = jnp.pad(jnp.transpose(w1), ((0, 0), (0, Hp - H))).astype(jnp.bfloat16)        # (H, Hp)
    w2_t = jnp.pad(jnp.transpose(w2), ((0, Hp - H), (0, Pp - P))).astype(jnp.bfloat16)   # (Hp, Pp)
    b1_p = jnp.pad(b1, (0, Hp - H)).reshape(1, Hp).astype(jnp.float32)
    b2_p = jnp.pad(b2, (0, Pp - P)).reshape(1, Pp).astype(jnp.float32)
    return dict(w1_t=w1_t, b1_p=b1_p, w2_t=w2_t, b2_p=b2_p, Hp=Hp, Pp=Pp)


def _weight_spec(shape, single_buffer):
    index_map = lambda b: (0,) * len(shape)
    if single_buffer:
        return pl.BlockSpec(shape, index_map, pipeline_mode=pl.Buffered(1))
    return pl.BlockSpec(shape, index_map)


def _make_ffn_call(*, B, S, H, Hp, Pp, Bt, bf16_epilogue, single_buffer_weights,
                   vmem_cap):
    # VMEM budget: double-buffered activation blocks + weights (once if the
    # single-buffer request holds, twice otherwise) + temporaries, with headroom.
    x_blk = Bt * S * H * 4
    out_blk = Bt * S * Pp * 4
    w_bytes = (H * Hp + Hp * Pp) * 2 + (Hp + Pp) * 4
    tmp = Bt * S * (2 * H + 4 * Hp + 4 * Pp)
    w_factor = 1 if single_buffer_weights else 2
    est = 2 * (x_blk + out_blk) + w_factor * w_bytes + tmp
    vmem_limit = int(min(max(int(est * 1.5), 32 * 2**20), vmem_cap))

    flops = B * S * (2 * H * Hp + 2 * Hp * Pp)
    bytes_accessed = (B * S * H * 4) + (H * Hp + Hp * Pp) * 2 \
        + (Hp + Pp) * 4 + (B * S * Pp * 4)

    kernel = functools.partial(_ffn_kernel, bf16_epilogue=bf16_epilogue)
    return pl.pallas_call(
        kernel,
        out_shape=jax.ShapeDtypeStruct((B, S, Pp), jnp.float32),
        grid_spec=pltpu.PrefetchScalarGridSpec(
            num_scalar_prefetch=0,
            grid=(B // Bt,),
            in_specs=[
                pl.BlockSpec((Bt, S, H), lambda b: (b, 0, 0)),      # activations
                _weight_spec((H, Hp), single_buffer_weights),        # W1^T
                _weight_spec((1, Hp), single_buffer_weights),        # b1
                _weight_spec((Hp, Pp), single_buffer_weights),       # W2^T
                _weight_spec((1, Pp), single_buffer_weights),        # b2
            ],
            out_specs=pl.BlockSpec((Bt, S, Pp), lambda b: (b, 0, 0)),
        ),
        compiler_params=pltpu.CompilerParams(
            dimension_semantics=("parallel",),
            vmem_limit_bytes=vmem_limit,
        ),
        cost_estimate=pl.CostEstimate(
            flops=flops, transcendentals=0, bytes_accessed=bytes_accessed),
    )


def custom_ffn_forward(hidden_states, prepared, *, hidden_size, num_patches):
    """Equivalent of CustomFFN.forward.

    hidden_states: (B, num_patches + 1, hidden_size) float32
    prepared:      output of prepare_ffn_params (padded bf16 weights)
    returns logits: (B, num_patches, num_patches) float32
    """
    B, S, H = hidden_states.shape
    P = num_patches
    assert S == P + 1 and H == hidden_size

    Hp, Pp = prepared["Hp"], prepared["Pp"]
    vmem_cap = _vmem_cap_bytes()
    Bt = _pick_batch_block(B, S, H, Hp, Pp, vmem_cap)
    bf16_epi = _bf16_epilogue_ok()

    args = (hidden_states, prepared["w1_t"], prepared["b1_p"],
            prepared["w2_t"], prepared["b2_p"])

    out_padded = None
    last_err = None
    # Prefer single-buffered grid-invariant weights; fall back to the default
    # double-buffering if this JAX/Mosaic version rejects pl.Buffered(1).
    for single_buffer in (True, False):
        try:
            call = _make_ffn_call(
                B=B, S=S, H=H, Hp=Hp, Pp=Pp, Bt=Bt,
                bf16_epilogue=bf16_epi, single_buffer_weights=single_buffer,
                vmem_cap=vmem_cap)
            out_padded = call(*args)
            last_err = None
            break
        except Exception as e:  # noqa: BLE001 - retry without Buffered(1)
            last_err = e
    if last_err is not None:
        raise last_err

    # Drop the CLS row and the zero-padded columns here (not in-kernel, which
    # would force a sublane-unaligned relayout every grid step).
    return out_padded[:, 1:, :P]


def init_params(key, hidden_size, num_patches):
    """Deterministic synthetic parameters matching nn.Linear shapes."""
    k1, k2, k3, k4 = jax.random.split(key, 4)
    s1 = 1.0 / jnp.sqrt(hidden_size)
    w1 = jax.random.uniform(k1, (hidden_size, hidden_size), jnp.float32, -s1, s1)
    b1 = jax.random.uniform(k2, (hidden_size,), jnp.float32, -s1, s1)
    w2 = jax.random.uniform(k3, (num_patches, hidden_size), jnp.float32, -s1, s1)
    b2 = jax.random.uniform(k4, (num_patches,), jnp.float32, -s1, s1)
    return (w1, b1, w2, b2)


if __name__ == "__main__":
    hidden_size = 32
    num_patches = 8
    batch = 2
    seq = num_patches + 1  # CLS token + patches

    key = jax.random.PRNGKey(0)
    kx, kp = jax.random.split(key)
    hidden_states = jax.random.normal(kx, (batch, seq, hidden_size), jnp.float32)
    params = init_params(kp, hidden_size, num_patches)

    # Weight glue done once, outside the per-call path.
    prepared = prepare_ffn_params(params, hidden_size=hidden_size,
                                  num_patches=num_patches)

    logits = custom_ffn_forward(hidden_states, prepared,
                                hidden_size=hidden_size, num_patches=num_patches)
    logits = jax.block_until_ready(logits)

    # pure-JAX f32 reference (kernel uses bf16 MXU inputs with f32 accumulation,
    # so tolerance is loosened accordingly)
    w1, b1, w2, b2 = params
    x = hidden_states[:, 1:, :].reshape(-1, num_patches, hidden_size)
    ref = jnp.maximum(x @ w1.T + b1, 0.0) @ w2.T + b2
    assert logits.shape == (batch, num_patches, num_patches)
    err = float(jnp.max(jnp.abs(logits - ref)))
    assert jnp.allclose(logits, ref, atol=5e-2, rtol=5e-2), err

    print("KERNEL_OK")
</pallas_src>

<mosaic_0001>
module attributes {stable_mosaic.version = 11 : i64} {
  func.func @_ffn_kernel(%arg0: i32, %arg1: memref<1x9x32xf32, #tpu.memory_space<vmem>>, %arg2: memref<32x128xbf16, #tpu.memory_space<vmem>>, %arg3: memref<1x128xf32, #tpu.memory_space<vmem>>, %arg4: memref<128x128xbf16, #tpu.memory_space<vmem>>, %arg5: memref<1x128xf32, #tpu.memory_space<vmem>>, %arg6: memref<1x9x128xf32, #tpu.memory_space<vmem>>) attributes {dimension_semantics = [#tpu.dimension_semantics<parallel>], iteration_bounds = array<i64: 2>, scalar_prefetch = 0 : i64, scratch_operands = 0 : i64, tpu.core_type = #tpu.core_type<tc>, window_params = [{transform_indices = @transform_0, window_bounds = array<i64: 1, 9, 32>}, {pipeline_mode = #tpu.pipeline_mode<synchronous>, transform_indices = @transform_1, window_bounds = array<i64: 32, 128>}, {pipeline_mode = #tpu.pipeline_mode<synchronous>, transform_indices = @transform_2, window_bounds = array<i64: 1, 128>}, {pipeline_mode = #tpu.pipeline_mode<synchronous>, transform_indices = @transform_3, window_bounds = array<i64: 128, 128>}, {pipeline_mode = #tpu.pipeline_mode<synchronous>, transform_indices = @transform_4, window_bounds = array<i64: 1, 128>}, {transform_indices = @transform_5, window_bounds = array<i64: 1, 9, 128>}]} {
    %c0 = arith.constant 0 : index
    %c0_0 = arith.constant 0 : index
    %0 = vector.load %arg2[%c0, %c0_0] : memref<32x128xbf16, #tpu.memory_space<vmem>>, vector<32x128xbf16>
    %c0_1 = arith.constant 0 : index
    %c0_2 = arith.constant 0 : index
    %1 = vector.load %arg4[%c0_1, %c0_2] : memref<128x128xbf16, #tpu.memory_space<vmem>>, vector<128x128xbf16>
    %c0_3 = arith.constant 0 : index
    %c0_4 = arith.constant 0 : index
    %2 = vector.load %arg5[%c0_3, %c0_4] : memref<1x128xf32, #tpu.memory_space<vmem>>, vector<1x128xf32>
    %c0_5 = arith.constant 0 : index
    %c0_6 = arith.constant 0 : index
    %3 = vector.load %arg3[%c0_5, %c0_6] : memref<1x128xf32, #tpu.memory_space<vmem>>, vector<1x128xf32>
    %c0_7 = arith.constant 0 : index
    %c0_8 = arith.constant 0 : index
    %c0_9 = arith.constant 0 : index
    %4 = vector.load %arg1[%c0_7, %c0_8, %c0_9] : memref<1x9x32xf32, #tpu.memory_space<vmem>>, vector<1x9x32xf32>
    %5 = vector.shape_cast %4 : vector<1x9x32xf32> to vector<9x32xf32>
    %6 = arith.truncf %5 : vector<9x32xf32> to vector<9x32xbf16>
    %cst = arith.constant dense<0.000000e+00> : vector<9x128xf32>
    %7 = tpu.matmul %6, %0, %cst {dimension_numbers = #tpu.dot_dimension_numbers<[1], [0], [0], [1], [0, 0, 1, 1], [], []>} : vector<9x32xbf16>, vector<32x128xbf16>, vector<9x128xf32> -> vector<9x128xf32>
    %8 = vector.broadcast %3 : vector<1x128xf32> to vector<9x128xf32>
    %9 = arith.addf %7, %8 : vector<9x128xf32>
    %cst_10 = arith.constant 0.000000e+00 : f32
    %10 = vector.broadcast %cst_10 : f32 to vector<9x128xf32>
    %11 = arith.maximumf %9, %10 : vector<9x128xf32>
    %12 = arith.truncf %11 : vector<9x128xf32> to vector<9x128xbf16>
    %cst_11 = arith.constant dense<0.000000e+00> : vector<9x128xf32>
    %13 = tpu.matmul %12, %1, %cst_11 {dimension_numbers = #tpu.dot_dimension_numbers<[1], [0], [0], [1], [0, 0, 1, 1], [], []>} : vector<9x128xbf16>, vector<128x128xbf16>, vector<9x128xf32> -> vector<9x128xf32>
    %14 = vector.broadcast %2 : vector<1x128xf32> to vector<9x128xf32>
    %15 = arith.addf %13, %14 : vector<9x128xf32>
    %c0_12 = arith.constant 0 : index
    %c0_13 = arith.constant 0 : index
    %c0_14 = arith.constant 0 : index
    %16 = vector.load %arg6[%c0_12, %c0_13, %c0_14] : memref<1x9x128xf32, #tpu.memory_space<vmem>>, vector<1x9x128xf32>
    %17 = vector.shape_cast %16 : vector<1x9x128xf32> to vector<9x128xf32>
    %18 = vector.shape_cast %15 : vector<9x128xf32> to vector<1x9x128xf32>
    tpu.vector_store %arg6[%c0_12, %c0_13, %c0_14], %18 {strides = array<i32>} : memref<1x9x128xf32, #tpu.memory_space<vmem>>, vector<1x9x128xf32>,
    return
  }
  func.func @transform_0(%arg0: i32) -> (i32, i32, i32) {
    %c0_i32 = arith.constant 0 : i32
    %c0_i32_0 = arith.constant 0 : i32
    %c0_i32_1 = arith.constant 0 : i32
    return %arg0, %c0_i32, %c0_i32_0 : i32, i32, i32
  }
  func.func @transform_1(%arg0: i32) -> (i32, i32) {
    %c0_i32 = arith.constant 0 : i32
    %c0_i32_0 = arith.constant 0 : i32
    %c0_i32_1 = arith.constant 0 : i32
    return %c0_i32, %c0_i32_0 : i32, i32
  }
  func.func @transform_2(%arg0: i32) -> (i32, i32) {
    %c0_i32 = arith.constant 0 : i32
    %c0_i32_0 = arith.constant 0 : i32
    %c0_i32_1 = arith.constant 0 : i32
    return %c0_i32, %c0_i32_0 : i32, i32
  }
  func.func @transform_3(%arg0: i32) -> (i32, i32) {
    %c0_i32 = arith.constant 0 : i32
    %c0_i32_0 = arith.constant 0 : i32
    %c0_i32_1 = arith.constant 0 : i32
    return %c0_i32, %c0_i32_0 : i32, i32
  }
  func.func @transform_4(%arg0: i32) -> (i32, i32) {
    %c0_i32 = arith.constant 0 : i32
    %c0_i32_0 = arith.constant 0 : i32
    %c0_i32_1 = arith.constant 0 : i32
    return %c0_i32, %c0_i32_0 : i32, i32
  }
  func.func @transform_5(%arg0: i32) -> (i32, i32, i32) {
    %c0_i32 = arith.constant 0 : i32
    %c0_i32_0 = arith.constant 0 : i32
    %c0_i32_1 = arith.constant 0 : i32
    return %arg0, %c0_i32, %c0_i32_0 : i32, i32, i32
  }
}

module attributes {stable_mosaic.version = 11 : i64} {
  func.func @_ffn_kernel(%arg0: i32, %arg1: memref<1x9x32xf32, #tpu.memory_space<vmem>>, %arg2: memref<32x128xbf16, #tpu.memory_space<vmem>>, %arg3: memref<1x128xf32, #tpu.memory_space<vmem>>, %arg4: memref<128x128xbf16, #tpu.memory_space<vmem>>, %arg5: memref<1x128xf32, #tpu.memory_space<vmem>>, %arg6: memref<1x9x128xf32, #tpu.memory_space<vmem>>) attributes {dimension_semantics = [#tpu.dimension_semantics<parallel>], iteration_bounds = array<i64: 2>, scalar_prefetch = 0 : i64, scratch_operands = 0 : i64, tpu.core_type = #tpu.core_type<tc>, window_params = [{transform_indices = @transform_0, window_bounds = array<i64: 1, 9, 32>}, {pipeline_mode = #tpu.pipeline_mode<synchronous>, transform_indices = @transform_1, window_bounds = array<i64: 32, 128>}, {pipeline_mode = #tpu.pipeline_mode<synchronous>, transform_indices = @transform_2, window_bounds = array<i64: 1, 128>}, {pipeline_mode = #tpu.pipeline_mode<synchronous>, transform_indices = @transform_3, window_bounds = array<i64: 128, 128>}, {pipeline_mode = #tpu.pipeline_mode<synchronous>, transform_indices = @transform_4, window_bounds = array<i64: 1, 128>}, {transform_indices = @transform_5, window_bounds = array<i64: 1, 9, 128>}]} {
    %c0 = arith.constant 0 : index
    %c0_0 = arith.constant 0 : index
    %0 = vector.load %arg2[%c0, %c0_0] : memref<32x128xbf16, #tpu.memory_space<vmem>>, vector<32x128xbf16>
    %c0_1 = arith.constant 0 : index
    %c0_2 = arith.constant 0 : index
    %1 = vector.load %arg4[%c0_1, %c0_2] : memref<128x128xbf16, #tpu.memory_space<vmem>>, vector<128x128xbf16>
    %c0_3 = arith.constant 0 : index
    %c0_4 = arith.constant 0 : index
    %2 = vector.load %arg5[%c0_3, %c0_4] : memref<1x128xf32, #tpu.memory_space<vmem>>, vector<1x128xf32>
    %c0_5 = arith.constant 0 : index
    %c0_6 = arith.constant 0 : index
    %3 = vector.load %arg3[%c0_5, %c0_6] : memref<1x128xf32, #tpu.memory_space<vmem>>, vector<1x128xf32>
    %c0_7 = arith.constant 0 : index
    %c0_8 = arith.constant 0 : index
    %c0_9 = arith.constant 0 : index
    %4 = vector.load %arg1[%c0_7, %c0_8, %c0_9] : memref<1x9x32xf32, #tpu.memory_space<vmem>>, vector<1x9x32xf32>
    %5 = vector.shape_cast %4 : vector<1x9x32xf32> to vector<9x32xf32>
    %6 = arith.truncf %5 : vector<9x32xf32> to vector<9x32xbf16>
    %cst = arith.constant dense<0.000000e+00> : vector<9x128xf32>
    %7 = tpu.matmul %6, %0, %cst {dimension_numbers = #tpu.dot_dimension_numbers<[1], [0], [0], [1], [0, 0, 1, 1], [], []>} : vector<9x32xbf16>, vector<32x128xbf16>, vector<9x128xf32> -> vector<9x128xf32>
    %8 = vector.broadcast %3 : vector<1x128xf32> to vector<9x128xf32>
    %9 = arith.addf %7, %8 : vector<9x128xf32>
    %cst_10 = arith.constant 0.000000e+00 : f32
    %10 = vector.broadcast %cst_10 : f32 to vector<9x128xf32>
    %11 = arith.maximumf %9, %10 : vector<9x128xf32>
    %12 = arith.truncf %11 : vector<9x128xf32> to vector<9x128xbf16>
    %cst_11 = arith.constant dense<0.000000e+00> : vector<9x128xf32>
    %13 = tpu.matmul %12, %1, %cst_11 {dimension_numbers = #tpu.dot_dimension_numbers<[1], [0], [0], [1], [0, 0, 1, 1], [], []>} : vector<9x128xbf16>, vector<128x128xbf16>, vector<9x128xf32> -> vector<9x128xf32>
    %14 = vector.broadcast %2 : vector<1x128xf32> to vector<9x128xf32>
    %15 = arith.addf %13, %14 : vector<9x128xf32>
    %c0_12 = arith.constant 0 : index
    %c0_13 = arith.constant 0 : index
    %c0_14 = arith.constant 0 : index
    %16 = vector.load %arg6[%c0_12, %c0_13, %c0_14] : memref<1x9x128xf32, #tpu.memory_space<vmem>>, vector<1x9x128xf32>
    %17 = vector.shape_cast %16 : vector<1x9x128xf32> to vector<9x128xf32>
    %18 = vector.shape_cast %15 : vector<9x128xf32> to vector<1x9x128xf32>
    tpu.vector_store %arg6[%c0_12, %c0_13, %c0_14], %18 {strides = array<i32>} : memref<1x9x128xf32, #tpu.memory_space<vmem>>, vector<1x9x128xf32>,
    return
  }
  func.func @transform_0(%arg0: i32) -> (i32, i32, i32) {
    %c0_i32 = arith.constant 0 : i32
    %c0_i32_0 = arith.constant 0 : i32
    %c0_i32_1 = arith.constant 0 : i32
    return %arg0, %c0_i32, %c0_i32_0 : i32, i32, i32
  }
  func.func @transform_1(%arg0: i32) -> (i32, i32) {
    %c0_i32 = arith.constant 0 : i32
    %c0_i32_0 = arith.constant 0 : i32
    %c0_i32_1 = arith.constant 0 : i32
    return %c0_i32, %c0_i32_0 : i32, i32
  }
  func.func @transform_2(%arg0: i32) -> (i32, i32) {
    %c0_i32 = arith.constant 0 : i32
    %c0_i32_0 = arith.constant 0 : i32
    %c0_i32_1 = arith.constant 0 : i32
    return %c0_i32, %c0_i32_0 : i32, i32
  }
  func.func @transform_3(%arg0: i32) -> (i32, i32) {
    %c0_i32 = arith.constant 0 : i32
    %c0_i32_0 = arith.constant 0 : i32
    %c0_i32_1 = arith.constant 0 : i32
    return %c0_i32, %c0_i32_0 : i32, i32
  }
  func.func @transform_4(%arg0: i32) -> (i32, i32) {
    %c0_i32 = arith.constant 0 : i32
    %c0_i32_0 = arith.constant 0 : i32
    %c0_i32_1 = arith.constant 0 : i32
    return %c0_i32, %c0_i32_0 : i32, i32
  }
  func.func @transform_5(%arg0: i32) -> (i32, i32, i32) {
    %c0_i32 = arith.constant 0 : i32
    %c0_i32_0 = arith.constant 0 : i32
    %c0_i32_1 = arith.constant 0 : i32
    return %arg0, %c0_i32, %c0_i32_0 : i32, i32, i32
  }
}

</mosaic_0001>

<bundles_post_ra>
// kernel: tpu_custom_call.1
= control target key start
LH: loop header
LB: loop body
LE: loop exit
PB: predicated region body
PF: predicated region fallthrough
CT: control target
= control target key end

     0   :  { %10 = vsyncpa [#allocation3], 0  ;;  %s602_s18 = smov 0   ;;  %s641_s0 = inlined_call_operand.vmem [shape: f32[2,9,32], index: 0, kind: input, shape index: {}]   ;;  %s642_s1 = inlined_call_operand.vmem [shape: bf16[32,128], index: 1, kind: input, shape index: {}]   ;;  %s643_s2 = inlined_call_operand.vmem [shape: f32[1,128], index: 2, kind: input, shape index: {}]   ;;  %s644_s3 = inlined_call_operand.hbm [shape: bf16[128,128], index: 3, kind: input, shape index: {}]   ;;  %s645_s4 = inlined_call_operand.vmem [shape: f32[1,128], index: 4, kind: input, shape index: {}]   ;;  %s646_s5 = inlined_call_operand.vmem [shape: f32[2,9,128], index: 5, kind: output, shape index: {}]  }
   0x1 LB: > { %s174_s21 = sshll.u32 %s644_s3, 4  ;;  %s438_s22 = sadd.s32 4294967295, %s567_s18   ;;  %s567_s18 = sphi %s602_s18, %s16_s18   ;;  %s175_s21 = int_to_ptr.hbm [resolvable:$true] %s174_s21 }
   0x2   : > { %p440_p0 = scmp.ge.s32.totalorder %s567_s18, 1  ;;  %p157_p1 = scmp.lt.s32.totalorder %s567_s18, 3 }
   0x3   : > { %p512_p2 = scmp.eq.s32.totalorder %s438_s22, 0  ;;  %s569_s23 = smov [#allocation2]  }
   0x4   : > { %p158_p3 = pnand %p440_p0, %p157_p1  ;;  %s176_s24 = sshll.u32 %s569_s23, 4  ;;  %s177_s24 = int_to_ptr.vmem [resolvable:$true] %s176_s24 }
   0x5   : > { %s570_s25 = smov 64   ;;  %s571_s26 = smov 4  }
   0x6   : > { %p508_p4 = pneg %p158_p3  ;;  %203 = sbr.rel (%p158_p3) target bundleno = 297 (0x129), region = 40 }
   0x8   : > { %p509_p5 = pnand %p512_p2, %p508_p4 }
   0xa   : > { %511 = dma.hbm_to_vmem [thread:$0]  (!%p509_p5), %s175_s21, 1024, %s177_s24, [#allocation3], %s570_s25, %s570_s25, %s571_s26  }
   0xb   : > { %562 = dma.done.wait (%p512_p2), [#allocation3], 1024  }
   0xc   : > { %564 = vsyncadd (%p512_p2), [#allocation3], 4294966272  ;;  %p232_p6 = scmp.lt.s32.totalorder %s438_s22, 1  ;;  %v495_v0 = vld [vmem:[%s642_s1 + $0x8] sm:$0xff]  ;;  %v494_v1 = vld [vmem:[%s642_s1] sm:$0xff]  ;;  %vm283_vm0 = vcmask 261120  }
   0xd   : > { %v503_v2 = vld [vmem:[#allocation2 + $0x38] sm:$0xff]  ;;  %293 = vmatpush.bf16.msra.mxu0 %v495_v0  ;;  %v502_v5 = vld [vmem:[#allocation2 + $0x30] sm:$0xff]  ;;  %v501_v7 = vld [vmem:[#allocation2 + $0x28] sm:$0xff] }
   0xe   : > { %s648_s22 = smov (!%p232_p6, %s438_s22), 1  ;;  %355 = vmatpush.bf16.msra.mxu1 %v503_v2  ;;  %v500_v8 = vld [vmem:[#allocation2 + $0x20] sm:$0xff]  ;;  %v499_v9 = vld [vmem:[#allocation2 + $0x18] sm:$0xff]  ;;  %v498_v10 = vld [vmem:[#allocation2 + $0x10] sm:$0xff] }
   0xf   : > { %s492_s27 = sshll.u32 %s648_s22, 4  ;;  %v497_v11 = vld [vmem:[#allocation2 + $0x8] sm:$0xff]  ;;  %v496_v12 = vld [vmem:[#allocation2] sm:$0xff] }
  0x10   : > { %s236_s30 = scalar_lea.vmem %s641_s0, %s492_s27  ;;  %v525_v14 = vld [vmem:[%s643_s2] ss:$0 sm:$0xff]  ;;  %s241_s16 = scalar_lea.vmem %s646_s5, %s492_s27 }
  0x11   : > { %v265_v3 = vld [vmem:[%s236_s30] sm:$0xff]  ;;  %v266_v4 = vld [vmem:[%s236_s30 + $0x8] sm:$0x1]  ;;  %294 = vmatpush.bf16.msra.mxu0 %v494_v1 }
  0x12   : > { %v267_v6 = vpack.c.bf16 %v266_v4, %v265_v3  ;;  %356 = vmatpush.bf16.msra.mxu1 %v502_v5  ;;  %v526_v21 = vld [vmem:[%s645_s4] ss:$0 sm:$0xff] }
  0x14   : > { %457 = vmatmul.msk.bf16.vlgmr.msra.gmra.mxu0 %vm283_vm0, %v267_v6 }
  0x16   : > { %357 = vmatpush.bf16.msra.mxu1 %v501_v7 }
  0x1a   : > { %358 = vmatpush.bf16.msra.mxu1 %v500_v8 }
  0x1e   : > { %359 = vmatpush.bf16.msra.mxu1 %v499_v9 }
  0x22   : > { %360 = vmatpush.bf16.msra.mxu1 %v498_v10 }
  0x26   : > { %361 = vmatpush.bf16.msra.mxu1 %v497_v11 }
  0x2a   : > { %362 = vmatpush.bf16.msra.mxu1 %v496_v12 }
  0x91   : > { %v296_v13 = vpop.f32.mrf.mxu0 }
  0x92   : > { %v297_v15 = vadd.f32 %v525_v14, %v296_v13 }
  0x94   : > { %v301_v18 = vmax.f32 %v297_v15, 0.0 }
  0x99   : > { %v298_v16 = vpop.f32.mrf.mxu0 }
  0x9a   : > { %v299_v17 = vadd.f32 %v525_v14, %v298_v16 }
  0x9c   : > { %v302_v19 = vmax.f32 %v299_v17, 0.0 }
  0x9e   : > { %v303_v20 = vpack.c.bf16 %v302_v19, %v301_v18 }
  0xa0   : > { %363 = vmatmul.bf16.vlgmr.msra.gmra.mxu1 %v303_v20 }
 0x11d   : > { %v364_v22 = vpop.f32.mrf.mxu1 }
 0x11e   : > { %v365_v23 = vadd.f32 %v526_v21, %v364_v22 }
 0x120   : > { %369 = vst [vmem:[%s241_s16] sm:$0xff] %v365_v23 }
 0x125   : > { %v366_v24 = vpop.f32.mrf.mxu1 }
 0x126   : > { %v367_v25 = vadd.f32 %v526_v21, %v366_v24 }
 0x128   : > { %370 = vst [vmem:[%s241_s16 + $0x8] sm:$0x1] %v367_v25 }
 0x129 PF: > { %s16_s18 = sadd.s32 1, %s567_s18  }
 0x12a   : > { %p13_p7 = scmp.ge.s32.totalorder %s16_s18, 4  }
 0x12c   :  { %15 = sbr.rel (!%p13_p7) target bundleno = 1 (0x1), region = 75 }
 0x131   :  { %392 = vsyncpa [#allocation3], 1 }
 0x132   :  { %394 = vsyncpa [#allocation3 + $0x1], 1 }

// kernel: tpu_custom_call.1
= control target key start
LH: loop header
LB: loop body
LE: loop exit
PB: predicated region body
PF: predicated region fallthrough
CT: control target
= control target key end

     0   :  { %10 = vsyncpa [#allocation3], 0  ;;  %s602_s18 = smov 0   ;;  %s641_s0 = inlined_call_operand.vmem [shape: f32[2,9,32], index: 0, kind: input, shape index: {}]   ;;  %s642_s1 = inlined_call_operand.vmem [shape: bf16[32,128], index: 1, kind: input, shape index: {}]   ;;  %s643_s2 = inlined_call_operand.vmem [shape: f32[1,128], index: 2, kind: input, shape index: {}]   ;;  %s644_s3 = inlined_call_operand.hbm [shape: bf16[128,128], index: 3, kind: input, shape index: {}]   ;;  %s645_s4 = inlined_call_operand.vmem [shape: f32[1,128], index: 4, kind: input, shape index: {}]   ;;  %s646_s5 = inlined_call_operand.vmem [shape: f32[2,9,128], index: 5, kind: output, shape index: {}]  }
   0x1 LB: > { %s174_s21 = sshll.u32 %s644_s3, 4  ;;  %s438_s22 = sadd.s32 4294967295, %s567_s18   ;;  %s567_s18 = sphi %s602_s18, %s16_s18   ;;  %s175_s21 = int_to_ptr.hbm [resolvable:$true] %s174_s21 }
   0x2   : > { %p440_p0 = scmp.ge.s32.totalorder %s567_s18, 1  ;;  %p157_p1 = scmp.lt.s32.totalorder %s567_s18, 3 }
   0x3   : > { %p512_p2 = scmp.eq.s32.totalorder %s438_s22, 0  ;;  %s569_s23 = smov [#allocation2]  }
   0x4   : > { %p158_p3 = pnand %p440_p0, %p157_p1  ;;  %s176_s24 = sshll.u32 %s569_s23, 4  ;;  %s177_s24 = int_to_ptr.vmem [resolvable:$true] %s176_s24 }
   0x5   : > { %s570_s25 = smov 64   ;;  %s571_s26 = smov 4  }
   0x6   : > { %p508_p4 = pneg %p158_p3  ;;  %203 = sbr.rel (%p158_p3) target bundleno = 297 (0x129), region = 40 }
   0x8   : > { %p509_p5 = pnand %p512_p2, %p508_p4 }
   0xa   : > { %511 = dma.hbm_to_vmem [thread:$0]  (!%p509_p5), %s175_s21, 1024, %s177_s24, [#allocation3], %s570_s25, %s570_s25, %s571_s26  }
   0xb   : > { %562 = dma.done.wait (%p512_p2), [#allocation3], 1024  }
   0xc   : > { %564 = vsyncadd (%p512_p2), [#allocation3], 4294966272  ;;  %p232_p6 = scmp.lt.s32.totalorder %s438_s22, 1  ;;  %v495_v0 = vld [vmem:[%s642_s1 + $0x8] sm:$0xff]  ;;  %v494_v1 = vld [vmem:[%s642_s1] sm:$0xff]  ;;  %vm283_vm0 = vcmask 261120  }
   0xd   : > { %v503_v2 = vld [vmem:[#allocation2 + $0x38] sm:$0xff]  ;;  %293 = vmatpush.bf16.msra.mxu0 %v495_v0  ;;  %v502_v5 = vld [vmem:[#allocation2 + $0x30] sm:$0xff]  ;;  %v501_v7 = vld [vmem:[#allocation2 + $0x28] sm:$0xff] }
   0xe   : > { %s648_s22 = smov (!%p232_p6, %s438_s22), 1  ;;  %355 = vmatpush.bf16.msra.mxu1 %v503_v2  ;;  %v500_v8 = vld [vmem:[#allocation2 + $0x20] sm:$0xff]  ;;  %v499_v9 = vld [vmem:[#allocation2 + $0x18] sm:$0xff]  ;;  %v498_v10 = vld [vmem:[#allocation2 + $0x10] sm:$0xff] }
   0xf   : > { %s492_s27 = sshll.u32 %s648_s22, 4  ;;  %v497_v11 = vld [vmem:[#allocation2 + $0x8] sm:$0xff]  ;;  %v496_v12 = vld [vmem:[#allocation2] sm:$0xff] }
  0x10   : > { %s236_s30 = scalar_lea.vmem %s641_s0, %s492_s27  ;;  %v525_v14 = vld [vmem:[%s643_s2] ss:$0 sm:$0xff]  ;;  %s241_s16 = scalar_lea.vmem %s646_s5, %s492_s27 }
  0x11   : > { %v265_v3 = vld [vmem:[%s236_s30] sm:$0xff]  ;;  %v266_v4 = vld [vmem:[%s236_s30 + $0x8] sm:$0x1]  ;;  %294 = vmatpush.bf16.msra.mxu0 %v494_v1 }
  0x12   : > { %v267_v6 = vpack.c.bf16 %v266_v4, %v265_v3  ;;  %356 = vmatpush.bf16.msra.mxu1 %v502_v5  ;;  %v526_v21 = vld [vmem:[%s645_s4] ss:$0 sm:$0xff] }
  0x14   : > { %457 = vmatmul.msk.bf16.vlgmr.msra.gmra.mxu0 %vm283_vm0, %v267_v6 }
  0x16   : > { %357 = vmatpush.bf16.msra.mxu1 %v501_v7 }
  0x1a   : > { %358 = vmatpush.bf16.msra.mxu1 %v500_v8 }
  0x1e   : > { %359 = vmatpush.bf16.msra.mxu1 %v499_v9 }
  0x22   : > { %360 = vmatpush.bf16.msra.mxu1 %v498_v10 }
  0x26   : > { %361 = vmatpush.bf16.msra.mxu1 %v497_v11 }
  0x2a   : > { %362 = vmatpush.bf16.msra.mxu1 %v496_v12 }
  0x91   : > { %v296_v13 = vpop.f32.mrf.mxu0 }
  0x92   : > { %v297_v15 = vadd.f32 %v525_v14, %v296_v13 }
  0x94   : > { %v301_v18 = vmax.f32 %v297_v15, 0.0 }
  0x99   : > { %v298_v16 = vpop.f32.mrf.mxu0 }
  0x9a   : > { %v299_v17 = vadd.f32 %v525_v14, %v298_v16 }
  0x9c   : > { %v302_v19 = vmax.f32 %v299_v17, 0.0 }
  0x9e   : > { %v303_v20 = vpack.c.bf16 %v302_v19, %v301_v18 }
  0xa0   : > { %363 = vmatmul.bf16.vlgmr.msra.gmra.mxu1 %v303_v20 }
 0x11d   : > { %v364_v22 = vpop.f32.mrf.mxu1 }
 0x11e   : > { %v365_v23 = vadd.f32 %v526_v21, %v364_v22 }
 0x120   : > { %369 = vst [vmem:[%s241_s16] sm:$0xff] %v365_v23 }
 0x125   : > { %v366_v24 = vpop.f32.mrf.mxu1 }
 0x126   : > { %v367_v25 = vadd.f32 %v526_v21, %v366_v24 }
 0x128   : > { %370 = vst [vmem:[%s241_s16 + $0x8] sm:$0x1] %v367_v25 }
 0x129 PF: > { %s16_s18 = sadd.s32 1, %s567_s18  }
 0x12a   : > { %p13_p7 = scmp.ge.s32.totalorder %s16_s18, 4  }
 0x12c   :  { %15 = sbr.rel (!%p13_p7) target bundleno = 1 (0x1), region = 75 }
 0x131   :  { %392 = vsyncpa [#allocation3], 1 }
 0x132   :  { %394 = vsyncpa [#allocation3 + $0x1], 1 }

</bundles_post_ra>
